<compile_context>
chip_gen: v7x
topology: tpu7x:2x2x1
jax: 0.10.0
libtpu: 0.0.40
codegen_flags: <defaults>
</compile_context>

<pallas_src>
import functools

import jax
import jax.numpy as jnp
from jax.experimental import pallas as pl
from jax.experimental.pallas import tpu as pltpu


def _stats_kernel(x_ref, psum_ref, pgram_ref):
    """Per-tile partial column sum and Gram matrix of x (zero-padded tail rows
    contribute nothing). Outputs are per-tile blocks -> 'parallel' grid."""
    x = x_ref[...]                                   # (TILE_M, C_in) f32
    c_in = x.shape[1]
    psum_ref[...] = jnp.sum(x, axis=0)[None, None, :]          # (1, 1, C_in)
    gram = jax.lax.dot_general(                                # X^T X  (C_in, C_in)
        x, x, dimension_numbers=(((0,), (0,)), ((), ())),
        preferred_element_type=jnp.float32)
    pgram_ref[...] = gram.reshape(1, c_in, c_in)


def _fused_conv_bn_kernel(x_ref, w_ref, b_ref, o_ref, *, unroll_k):
    """out = x @ W_fold + b_fold  (BN already folded into W_fold / b_fold)."""
    x = x_ref[...]                                   # (TILE_M, C_in)
    w = w_ref[...]                                   # (C_in, C_out)
    if unroll_k:
        # Degenerate K: unrolled broadcast-FMA on the VPU avoids MXU push/pop
        # latency for a 4-wide contraction.
        acc = jnp.zeros(o_ref.shape, jnp.float32)
        for kk in range(w.shape[0]):
            acc = acc + x[:, kk:kk + 1] * w[kk:kk + 1, :]
    else:
        # Real ResNet widths (C_in/C_out >= 128): MXU path.
        # TODO(synk): cast x/w to bf16 on v6e/v7x to halve input DMA bytes.
        acc = jnp.dot(x, w, preferred_element_type=jnp.float32)
    o_ref[...] = (acc + b_ref[...]).astype(o_ref.dtype)


def downsample_forward(x_nchw, conv_w, conv_b, bn_gamma, bn_beta, eps=1e-5):
    N, C_in, H, W = x_nchw.shape
    C_out = conv_w.shape[0]
    Ho, Wo = (H + 1) // 2, (W + 1) // 2              # 1x1, stride 2, pad 0
    M = N * Ho * Wo

    # 1x1/stride-2 conv == channel matmul at strided spatial positions.
    # slice+transpose+reshape fuse into one XLA copy of the quarter-size input.
    # TODO(synk): fold the ::2 selection / NCHW->NHWC shuffle into the kernel's
    # DMA (strided pl.ds on H/W) to remove this XLA pass for very large inputs.
    x_rows = jnp.transpose(x_nchw[:, :, ::2, ::2], (0, 2, 3, 1)).reshape(M, C_in)
    x_rows = x_rows.astype(jnp.float32)

    # Large, sublane-aligned row tiles; zero-pad the tail (safe for the stats,
    # padded output rows are sliced off). Tile sizes stay well inside the
    # default scoped-VMEM budget even at ResNet widths (v7x: 32 MiB scoped).
    TILE_M = 512
    if M < TILE_M:
        TILE_M = max(8, ((M + 7) // 8) * 8)
    num_tiles = pl.cdiv(M, TILE_M)
    M_pad = num_tiles * TILE_M
    if M_pad != M:
        x_rows = jnp.pad(x_rows, ((0, M_pad - M), (0, 0)))

    w2d = conv_w.reshape(C_out, C_in).T.astype(jnp.float32)     # (C_in, C_out)
    conv_b = conv_b.astype(jnp.float32)

    # ---- pass 1: per-tile partial (sum_x, X^T X), fully parallel -----------
    psum, pgram = pl.pallas_call(
        _stats_kernel,
        out_shape=(
            jax.ShapeDtypeStruct((num_tiles, 1, C_in), jnp.float32),
            jax.ShapeDtypeStruct((num_tiles, C_in, C_in), jnp.float32),
        ),
        grid=(num_tiles,),
        in_specs=[pl.BlockSpec((TILE_M, C_in), lambda i: (i, 0))],
        out_specs=(
            pl.BlockSpec((1, 1, C_in), lambda i: (i, 0, 0)),
            pl.BlockSpec((1, C_in, C_in), lambda i: (i, 0, 0)),
        ),
        compiler_params=pltpu.CompilerParams(
            dimension_semantics=("parallel",)),
    )(x_rows)

    # ---- tiny per-channel math in JAX: fold BN into the conv ---------------
    colsum = jnp.sum(psum, axis=(0, 1))                          # (C_in,)
    gram = jnp.sum(pgram, axis=0)                                # (C_in, C_in)
    mu_x = colsum / M
    cov_x = gram / M - jnp.outer(mu_x, mu_x)
    # var(y_j) = W_j^T Cov(x) W_j  (the conv bias cancels); clamp vs cancellation
    var = jnp.maximum(jnp.sum((cov_x @ w2d) * w2d, axis=0), 0.0)  # (C_out,)
    mean_y = mu_x @ w2d + conv_b                                  # (C_out,)
    scale = bn_gamma.astype(jnp.float32) * jax.lax.rsqrt(var + eps)
    w_fold = w2d * scale[None, :]                                 # (C_in, C_out)
    b_fold = (conv_b - mean_y) * scale + bn_beta.astype(jnp.float32)
    # TODO(synk): PyTorch training mode also updates running_mean/running_var;
    # that state bookkeeping does not affect the forward output and is omitted.

    # ---- pass 2: fused conv+BN matmul, single HBM write of the output ------
    unroll_k = C_in <= 32
    kernel = functools.partial(_fused_conv_bn_kernel, unroll_k=unroll_k)
    out_rows = pl.pallas_call(
        kernel,
        out_shape=jax.ShapeDtypeStruct((M_pad, C_out), jnp.float32),
        grid=(num_tiles,),
        in_specs=[
            pl.BlockSpec((TILE_M, C_in), lambda i: (i, 0)),
            pl.BlockSpec((C_in, C_out), lambda i: (0, 0)),
            pl.BlockSpec((1, C_out), lambda i: (0, 0)),
        ],
        out_specs=pl.BlockSpec((TILE_M, C_out), lambda i: (i, 0)),
        compiler_params=pltpu.CompilerParams(
            dimension_semantics=("parallel",)),
    )(x_rows, w_fold, b_fold.reshape(1, C_out))

    return out_rows[:M].reshape(N, Ho, Wo, C_out).transpose(0, 3, 1, 2)


if __name__ == "__main__":
    N, C_in, C_out, H, W = 2, 4, 8, 16, 16
    eps = 1e-5

    key = jax.random.PRNGKey(0)
    kx, kw, kb = jax.random.split(key, 3)

    x = jax.random.normal(kx, (N, C_in, H, W), dtype=jnp.float32)
    conv_w = jax.random.normal(kw, (C_out, C_in, 1, 1), dtype=jnp.float32) * 0.1
    conv_b = jax.random.normal(kb, (C_out,), dtype=jnp.float32) * 0.1
    bn_gamma = jnp.ones((C_out,), dtype=jnp.float32)
    bn_beta = jnp.zeros((C_out,), dtype=jnp.float32)

    out = downsample_forward(x, conv_w, conv_b, bn_gamma, bn_beta, eps)
    out = jax.block_until_ready(out)

    # Pure-JAX reference (conv -> training-mode BN with biased batch variance).
    y_ref = jnp.einsum("nchw,oc->nohw", x[:, :, ::2, ::2],
                       conv_w.reshape(C_out, C_in)) + conv_b[None, :, None, None]
    mean_r = y_ref.mean(axis=(0, 2, 3), keepdims=True)
    var_r = ((y_ref - mean_r) ** 2).mean(axis=(0, 2, 3), keepdims=True)
    ref = ((y_ref - mean_r) / jnp.sqrt(var_r + eps)
           * bn_gamma[None, :, None, None] + bn_beta[None, :, None, None])

    assert out.shape == (N, C_out, H // 2, W // 2), out.shape
    assert jnp.allclose(out, ref, atol=1e-4, rtol=1e-4), float(
        jnp.max(jnp.abs(out - ref)))
    print("KERNEL_OK")
</pallas_src>

<mosaic_0001>
module attributes {stable_mosaic.version = 11 : i64} {
  func.func @_stats_kernel(%arg0: i32, %arg1: memref<128x4xf32, #tpu.memory_space<vmem>>, %arg2: memref<1x1x4xf32, #tpu.memory_space<vmem>>, %arg3: memref<1x4x4xf32, #tpu.memory_space<vmem>>) attributes {dimension_semantics = [#tpu.dimension_semantics<parallel>], iteration_bounds = array<i64: 1>, scalar_prefetch = 0 : i64, scratch_operands = 0 : i64, tpu.core_type = #tpu.core_type<tc>, window_params = [{transform_indices = @transform_0, window_bounds = array<i64: 128, 4>}, {transform_indices = @transform_1, window_bounds = array<i64: 1, 1, 4>}, {transform_indices = @transform_2, window_bounds = array<i64: 1, 4, 4>}]} {
    %c0 = arith.constant 0 : index
    %c0_0 = arith.constant 0 : index
    %0 = vector.load %arg1[%c0, %c0_0] : memref<128x4xf32, #tpu.memory_space<vmem>>, vector<128x4xf32>
    %cst = arith.constant dense<0.000000e+00> : vector<4xf32>
    %1 = vector.multi_reduction <add>, %0, %cst [0] : vector<128x4xf32> to vector<4xf32>
    %2 = vector.shape_cast %1 : vector<4xf32> to vector<1x1x4xf32>
    %c0_1 = arith.constant 0 : index
    %c0_2 = arith.constant 0 : index
    %c0_3 = arith.constant 0 : index
    %3 = vector.load %arg2[%c0_1, %c0_2, %c0_3] : memref<1x1x4xf32, #tpu.memory_space<vmem>>, vector<1x1x4xf32>
    tpu.vector_store %arg2[%c0_1, %c0_2, %c0_3], %2 {strides = array<i32>} : memref<1x1x4xf32, #tpu.memory_space<vmem>>, vector<1x1x4xf32>,
    %cst_4 = arith.constant dense<0.000000e+00> : vector<4x4xf32>
    %4 = tpu.matmul %0, %0, %cst_4 {dimension_numbers = #tpu.dot_dimension_numbers<[0], [0], [1], [1], [0, 1, 1, 1], [], []>} : vector<128x4xf32>, vector<128x4xf32>, vector<4x4xf32> -> vector<4x4xf32>
    %5 = vector.shape_cast %4 : vector<4x4xf32> to vector<1x4x4xf32>
    %c0_5 = arith.constant 0 : index
    %c0_6 = arith.constant 0 : index
    %c0_7 = arith.constant 0 : index
    %6 = vector.load %arg3[%c0_5, %c0_6, %c0_7] : memref<1x4x4xf32, #tpu.memory_space<vmem>>, vector<1x4x4xf32>
    tpu.vector_store %arg3[%c0_5, %c0_6, %c0_7], %5 {strides = array<i32>} : memref<1x4x4xf32, #tpu.memory_space<vmem>>, vector<1x4x4xf32>,
    return
  }
  func.func @transform_0(%arg0: i32) -> (i32, i32) {
    %c0_i32 = arith.constant 0 : i32
    %c0_i32_0 = arith.constant 0 : i32
    return %arg0, %c0_i32 : i32, i32
  }
  func.func @transform_1(%arg0: i32) -> (i32, i32, i32) {
    %c0_i32 = arith.constant 0 : i32
    %c0_i32_0 = arith.constant 0 : i32
    %c0_i32_1 = arith.constant 0 : i32
    return %arg0, %c0_i32, %c0_i32_0 : i32, i32, i32
  }
  func.func @transform_2(%arg0: i32) -> (i32, i32, i32) {
    %c0_i32 = arith.constant 0 : i32
    %c0_i32_0 = arith.constant 0 : i32
    %c0_i32_1 = arith.constant 0 : i32
    return %arg0, %c0_i32, %c0_i32_0 : i32, i32, i32
  }
}

</mosaic_0001>

<bundles_post_ra>
// kernel: tpu_custom_call.1
= control target key start
LH: loop header
LB: loop body
LE: loop exit
PB: predicated region body
PF: predicated region fallthrough
CT: control target
= control target key end

     0   :  { %8 = vsyncpa [#allocation3], 0  ;;  %vm28_vm0 = vcmask 31744   ;;  %v329_v6 = vmov 0.0|0.0   ;;  %s445_s0 = inlined_call_operand.vmem [shape: f32[128,4], index: 0, kind: input, shape index: {}]   ;;  %s446_s1 = inlined_call_operand.hbm [shape: f32[1,1,4], index: 1, kind: output, shape index: {0}]   ;;  %s447_s2 = inlined_call_operand.hbm [shape: f32[1,4,4], index: 2, kind: output, shape index: {1}]  }
   0x1   :  { %v12_v0 = vld [vmem:[%s445_s0] sm:$0xff]  ;;  %v13_v1 = vld [vmem:[%s445_s0 + $0x8] sm:$0xff]  ;;  %v14_v2 = vld [vmem:[%s445_s0 + $0x10] sm:$0xff]  ;;  %252 = vmatprep.subr.bf16.mxu0 %v329_v6 }
   0x2   :  { %v29_v3 = vsel %vm28_vm0, %v12_v0, 0.0  ;;  %68 = vxpose.xlu0.b32.start [1/16] (narrow) %v12_v0, 8  ;;  %v30_v4 = vsel %vm28_vm0, %v13_v1, 0.0  ;;  %v32_v5 = vsel %vm28_vm0, %v14_v2, 0.0  ;;  %v253_v7 = vpack.c.bf16 %v13_v1, %v12_v0  ;;  %v15_v9 = vld [vmem:[%s445_s0 + $0x18] sm:$0xff]  ;;  %v16_v13 = vld [vmem:[%s445_s0 + $0x20] sm:$0xff] }
   0x3   :  { %v31_v8 = vadd.f32 %v30_v4, %v29_v3  ;;  %v34_v10 = vsel %vm28_vm0, %v15_v9, 0.0  ;;  %v256_v11 = vpack.c.bf16 %v15_v9, %v14_v2  ;;  %v36_v14 = vsel %vm28_vm0, %v16_v13, 0.0  ;;  %v17_v16 = vld [vmem:[%s445_s0 + $0x28] sm:$0xff] }
   0x4   :  { %254 = vmatpush3.bf16.msra.mxu0 %v253_v7 }
   0x5   :  { %v33_v12 = vadd.f32 %v32_v5, %v31_v8  ;;  %255 = vmatprep.subr.bf16.mxu0 %v329_v6 }
   0x6   :  { %69 = vxpose.xlu0.b32.cont [2/16] (narrow) %v13_v1, 8 }
   0x7   :  { %v35_v15 = vadd.f32 %v34_v10, %v33_v12 }
   0x8   :  { %9 = vsyncpa [#allocation5], 0  ;;  %v38_v17 = vsel %vm28_vm0, %v17_v16, 0.0  ;;  %257 = vmatpush3.bf16.msra.mxu0 %v256_v11  ;;  %v259_v18 = vpack.c.bf16 %v17_v16, %v16_v13  ;;  %v18_v20 = vld [vmem:[%s445_s0 + $0x30] sm:$0xff]  ;;  %vm330_vm1 = vmmov 0   ;;  %v331_v21 = vmov 0.0  }
   0x9   :  { %v37_v19 = vadd.f32 %v36_v14, %v35_v15  ;;  %258 = vmatprep.subr.bf16.mxu0 %v329_v6  ;;  %249 = vmatprep.mubr.msk.f32.mxu0 %vm330_vm1, %v331_v21  ;;  %v40_v22 = vsel %vm28_vm0, %v18_v20, 0.0  ;;  %v19_v24 = vld [vmem:[%s445_s0 + $0x38] sm:$0xff]  ;;  %v20_v28 = vld [vmem:[%s445_s0 + $0x40] sm:$0xff]  ;;  %v21_v31 = vld [vmem:[%s445_s0 + $0x48] sm:$0xff]  ;;  %vm66_vm2 = vcmask 24576  }
   0xa   :  { %70 = vxpose.xlu0.b32.cont [3/16] (narrow) %v14_v2, 8  ;;  %v42_v25 = vsel %vm28_vm0, %v19_v24, 0.0  ;;  %v262_v26 = vpack.c.bf16 %v19_v24, %v18_v20  ;;  %v44_v29 = vsel %vm28_vm0, %v20_v28, 0.0  ;;  %v46_v32 = vsel %vm28_vm0, %v21_v31, 0.0  ;;  %v22_v35 = vld [vmem:[%s445_s0 + $0x50] sm:$0xff]  ;;  %v23_v38 = vld [vmem:[%s445_s0 + $0x58] sm:$0xff] }
   0xb   :  { %v39_v23 = vadd.f32 %v38_v17, %v37_v19  ;;  %v265_v33 = vpack.c.bf16 %v21_v31, %v20_v28  ;;  %v48_v36 = vsel %vm28_vm0, %v22_v35, 0.0  ;;  %v50_v39 = vsel %vm28_vm0, %v23_v38, 0.0  ;;  %v24_v42 = vld [vmem:[%s445_s0 + $0x60] sm:$0xff]  ;;  %v25_v45 = vld [vmem:[%s445_s0 + $0x68] sm:$0xff]  ;;  %v26_v49 = vld [vmem:[%s445_s0 + $0x70] sm:$0xff] }
   0xc   :  { %260 = vmatpush3.bf16.msra.mxu0 %v259_v18  ;;  %v268_v40 = vpack.c.bf16 %v23_v38, %v22_v35  ;;  %v52_v43 = vsel %vm28_vm0, %v24_v42, 0.0  ;;  %v54_v46 = vsel %vm28_vm0, %v25_v45, 0.0  ;;  %v271_v47 = vpack.c.bf16 %v25_v45, %v24_v42  ;;  %v27_v52 = vld [vmem:[%s445_s0 + $0x78] sm:$0xff]  ;;  %s332_s0 = smov [#allocation2]  }
   0xd   :  { %v41_v27 = vadd.f32 %v40_v22, %v39_v23  ;;  %261 = vmatprep.subr.bf16.mxu0 %v329_v6  ;;  %v56_v50 = vsel %vm28_vm0, %v26_v49, 0.0  ;;  %v58_v53 = vsel %vm28_vm0, %v27_v52, 0.0  ;;  %v274_v54 = vpack.c.bf16 %v27_v52, %v26_v49  ;;  %s178_s13 = sshll.u32 %s332_s0, 4  ;;  %s179_s13 = int_to_ptr.vmem [resolvable:$true] %s178_s13 }
   0xe   :  { %71 = vxpose.xlu0.b32.cont [4/16] (narrow) %v15_v9, 8  ;;  %s281_s14 = scalar_lea.vmem %s179_s13, 16  ;;  %s285_s15 = scalar_lea.vmem %s179_s13, 32 }
   0xf   :  { %v43_v30 = vadd.f32 %v42_v25, %v41_v27  ;;  %p282_p0 = scmp.ne.s32.totalorder %s179_s13, %s281_s14  ;;  %p286_p1 = scmp.lt.s32.totalorder %s179_s13, %s179_s13 }
  0x10   :  { %263 = vmatpush3.bf16.msra.mxu0 %v262_v26  ;;  %p287_p2 = scmp.lt.s32.totalorder %s285_s15, %s281_s14 }
  0x11   :  { %v45_v34 = vadd.f32 %v44_v29, %v43_v30  ;;  %264 = vmatprep.subr.bf16.mxu0 %v329_v6 }
  0x12   :  { %72 = vxpose.xlu0.b32.cont [5/16] (narrow) %v16_v13, 8  ;;  %p288_p3 = por %p287_p2, %p286_p1 }
  0x13   :  { %v47_v37 = vadd.f32 %v46_v32, %v45_v34 }
  0x14   :  { %266 = vmatpush3.bf16.msra.mxu0 %v265_v33  ;;  %p289_p4 = pnand %p288_p3, %p282_p0 }
  0x15   :  { %v49_v41 = vadd.f32 %v48_v36, %v47_v37  ;;  %267 = vmatprep.subr.bf16.mxu0 %v329_v6 }
  0x16   :  { %73 = vxpose.xlu0.b32.cont [6/16] (narrow) %v17_v16, 8 }
  0x17   :  { %v51_v44 = vadd.f32 %v50_v39, %v49_v41 }
  0x18   :  { %269 = vmatpush3.bf16.msra.mxu0 %v268_v40 }
  0x19   :  { %v53_v48 = vadd.f32 %v52_v43, %v51_v44  ;;  %270 = vmatprep.subr.bf16.mxu0 %v329_v6 }
  0x1a   :  { %74 = vxpose.xlu0.b32.cont [7/16] (narrow) %v18_v20, 8 }
  0x1b   :  { %v55_v51 = vadd.f32 %v54_v46, %v53_v48 }
  0x1c   :  { %272 = vmatpush3.bf16.msra.mxu0 %v271_v47 }
  0x1d   :  { %v57_v55 = vadd.f32 %v56_v50, %v55_v51  ;;  %273 = vmatprep.subr.bf16.mxu0 %v329_v6 }
  0x1e   :  { %75 = vxpose.xlu0.b32.cont [8/16] (narrow) %v19_v24, 8 }
  0x1f   :  { %v59_v56 = vadd.f32 %v58_v53, %v57_v55 }
  0x20   :  { %275 = vmatpush3.bf16.msra.mxu0 %v274_v54 }
  0x21   :  { %v60_v58 = vrot.slane %v59_v56, 4 }
  0x22   :  { %76 = vxpose.xlu0.b32.cont [9/16] (narrow) %v20_v28, 8 }
  0x23   :  { %v61_v59 = vadd.f32 %v60_v58, %v59_v56 }
  0x25   :  { %v62_v60 = vrot.slane %v61_v59, 2 }
  0x26   :  { %77 = vxpose.xlu0.b32.cont [10/16] (narrow) %v21_v31, 8 }
  0x27   :  { %v63_v61 = vadd.f32 %v62_v60, %v61_v59 }
  0x29   :  { %v64_v62 = vrot.slane %v63_v61, 1 }
  0x2a   :  { %78 = vxpose.xlu0.b32.cont [11/16] (narrow) %v22_v35, 8 }
  0x2b   :  { %v65_v63 = vadd.f32 %v64_v62, %v63_v61 }
  0x2d   :  { %67 = vst.msk [vmem:[#allocation2] sm:$0x1] %vm66_vm2, %v65_v63 }
  0x2e   :  { %79 = vxpose.xlu0.b32.cont [12/16] (narrow) %v23_v38, 8 }
  0x32   :  { %80 = vxpose.xlu0.b32.cont [13/16] (narrow) %v24_v42, 8 }
  0x36   :  { %81 = vxpose.xlu0.b32.cont [14/16] (narrow) %v25_v45, 8 }
  0x3a   :  { %82 = vxpose.xlu0.b32.cont [15/16] (narrow) %v26_v49, 8 }
  0x3e   :  { %83 = vxpose.xlu0.b32.end [16/16] (narrow) %v27_v52, 8 }
  0x82   :  { %v84_v57 = vpop.trf.xlu0 }
  0x83   :  { %250 = vmatmul.mubr.f32.vlgmr.msra.gmra.mrb[0].mxu0 %v84_v57 }
  0x84   :  { %292 = shalt.err (!%p289_p4)
}
  0x85   :  { %s293_s18 = scalar_lea.hbm %s446_s1, 16 }
  0x86   :  { %p294_p5 = scmp.ne.s32.totalorder %s446_s1, %s293_s18  ;;  %p297_p6 = scmp.lt.u32.totalorder %s293_s18, %s446_s1 }
  0x88   :  { %p299_p7 = pnand %p297_p6, %p294_p5 }
  0x8a   :  { %302 = shalt.err (!%p299_p7)
}
  0x8b   :  { %181 = dma.vmem_to_hbm [thread:$0]  %s179_s13, 16, %s446_s1, [#allocation3]   ;;  %vm170_vm3 = vcmask 27648  }
  0x8c   :  { %s333_s25 = smov [#allocation4]  }
  0x8d   :  { %s188_s26 = sshll.u32 %s333_s25, 4  ;;  %s189_s26 = int_to_ptr.vmem [resolvable:$true] %s188_s26 }
  0x8e   :  { %s303_s27 = scalar_lea.vmem %s189_s26, 64  ;;  %p308_p9 = scmp.lt.s32.totalorder %s189_s26, %s189_s26 }
  0x8f   :  { %p304_p8 = scmp.ne.s32.totalorder %s189_s26, %s303_s27  ;;  %p309_p10 = scmp.lt.s32.totalorder %s303_s27, %s303_s27 }
  0x91   :  { %p310_p11 = por %p309_p10, %p308_p9 }
  0x93   :  { %p311_p12 = pnand %p310_p11, %p304_p8 }
 0x156   :  { %v166_v0 = vpop.f32.mrb[0].mxu0 }
 0x157   :  { %171 = vst.msk [vmem:[#allocation4] sm:$0xf] %vm170_vm3, %v166_v0  ;;  %v251_v1 = vpop.f32.mrb[1].mxu0 }
 0x158   :  { %314 = shalt.err (!%p311_p12)
}
 0x159   :  { %s315_s30 = scalar_lea.hbm %s447_s2, 64 }
 0x15a   :  { %p316_p13 = scmp.ne.s32.totalorder %s447_s2, %s315_s30  ;;  %p319_p0 = scmp.lt.u32.totalorder %s315_s30, %s447_s2 }
 0x15c   :  { %p321_p1 = pnand %p319_p0, %p316_p13 }
 0x15e   :  { %324 = shalt.err (!%p321_p1)
}
 0x15f   :  { %191 = dma.vmem_to_hbm [thread:$0]  %s189_s26, 64, %s447_s2, [#allocation5]  }
 0x160   :  { %325 = dma.done.wait [#allocation3], 16  }
 0x161   :  { %326 = vsyncadd [#allocation3], 4294967280 }
 0x162   :  { %327 = dma.done.wait [#allocation5], 64  }
 0x163   :  { %328 = vsyncadd [#allocation5], 4294967232 }
 0x164   :  { %198 = vsyncpa [#allocation3], 1 }
 0x165   :  { %199 = vsyncpa [#allocation5], 1 }

</bundles_post_ra>
